<compile_context>
chip_gen: v7x
topology: tpu7x:2x2x1
jax: 0.10.0
libtpu: 0.0.40
codegen_flags: <defaults>
</compile_context>

<pallas_src>
import functools

import jax
import jax.numpy as jnp
from jax.experimental import pallas as pl
from jax.experimental.pallas import tpu as pltpu

LANE = 128  # lane width used to pad W4 / b4 / output for lane-dense stores


def _model3_kernel(x_ref, w_ref, b_ref, out_ref, *, D):
    # x: (B, S, D) f32
    # w: (6, D, LANE) f32  -> [Wq, Wv, W1, W2, W3] in cols [:D], W4 padded in row 5
    # b: (6, LANE)   f32  -> [bq, bv, b1, b2, b3] in cols [:D], b4 padded in row 5
    # out: (B, LANE) f32  -> real result in column 0
    x = x_ref[...]                                   # (B, S, D)
    w = w_ref[...]                                   # (6, D, LANE)
    b = b_ref[...]                                   # (6, LANE)

    wq = w[0, :, :D]
    wv = w[1, :, :D]
    w1 = w[2, :, :D]
    w2 = w[3, :, :D]
    w3 = w[4, :, :D]
    w4 = w[5]                                        # (D, LANE), real weights in col 0

    bq = b[0:1, :D]
    bv = b[1:2, :D]
    b1 = b[2:3, :D]
    b2 = b[3:4, :D]
    b3 = b[4:5, :D]
    b4 = b[5:6, :]                                   # (1, LANE), real bias in col 0

    # ---- temporal mean over the sequence axis + query projection ------------
    tm = jnp.mean(x, axis=1)                                            # (B, D)
    qtm = jnp.dot(tm, wq, preferred_element_type=jnp.float32) + bq      # (B, D)

    # ---- attention logits & softmax over the sequence dimension -------------
    att = jnp.sum(x * qtm[:, None, :], axis=-1)                         # (B, S)
    att = att - jnp.max(att, axis=1, keepdims=True)
    att = jnp.exp(att)
    att = att / jnp.sum(att, axis=1, keepdims=True)                     # (B, S)

    # ---- attention-pool x FIRST, then project once with Wv ------------------
    # Exact because softmax weights sum to 1:
    #   sum_s att*(x Wv + bv) = (sum_s att*x) Wv + bv
    xp = jnp.sum(x * att[:, :, None], axis=1)                           # (B, D)
    pooled = jnp.dot(xp, wv, preferred_element_type=jnp.float32) + bv   # (B, D)

    # ---- MLP head: Linear/ReLU x3, Linear (lane-padded), Sigmoid ------------
    h = jnp.maximum(
        jnp.dot(pooled, w1, preferred_element_type=jnp.float32) + b1, 0.0)
    h = jnp.maximum(
        jnp.dot(h, w2, preferred_element_type=jnp.float32) + b2, 0.0)
    h = jnp.maximum(
        jnp.dot(h, w3, preferred_element_type=jnp.float32) + b3, 0.0)
    z = jnp.dot(h, w4, preferred_element_type=jnp.float32) + b4          # (B, LANE)
    out_ref[...] = jax.nn.sigmoid(z).astype(out_ref.dtype)


def pack_params(p, D):
    """Pack the 12 parameter tensors into (w_all, b_all) for the kernel."""
    assert p["w1"].shape == (D, D), "packing assumes input_size == hidden_size"
    O = p["w4"].shape[1]
    assert O <= LANE

    w_all = jnp.zeros((6, D, LANE), jnp.float32)
    w_all = w_all.at[0, :, :D].set(p["wq"])
    w_all = w_all.at[1, :, :D].set(p["wv"])
    w_all = w_all.at[2, :, :D].set(p["w1"])
    w_all = w_all.at[3, :, :D].set(p["w2"])
    w_all = w_all.at[4, :, :D].set(p["w3"])
    w_all = w_all.at[5, :, :O].set(p["w4"])

    b_all = jnp.zeros((6, LANE), jnp.float32)
    b_all = b_all.at[0, :D].set(p["bq"].reshape(-1))
    b_all = b_all.at[1, :D].set(p["bv"].reshape(-1))
    b_all = b_all.at[2, :D].set(p["b1"].reshape(-1))
    b_all = b_all.at[3, :D].set(p["b2"].reshape(-1))
    b_all = b_all.at[4, :D].set(p["b3"].reshape(-1))
    b_all = b_all.at[5, :O].set(p["b4"].reshape(-1))
    return w_all, b_all


def model3_forward(x, w_all, b_all, output_size=1):
    """x: (B, S, D) float32. w_all: (6, D, 128). b_all: (6, 128)."""
    B, S, D = x.shape
    kernel = functools.partial(_model3_kernel, D=D)
    vmem = pl.BlockSpec(memory_space=pltpu.MemorySpace.VMEM)
    # Tiny problem: single grid point, everything resident in VMEM, whole
    # forward fused into one kernel invocation; lane-dense (B,128) output.
    out = pl.pallas_call(
        kernel,
        out_shape=jax.ShapeDtypeStruct((B, LANE), jnp.float32),
        in_specs=[vmem, vmem, vmem],
        out_specs=vmem,
    )(x, w_all, b_all)
    return out[:, :output_size]


def init_params(key, input_size, hidden_size, output_size):
    """Deterministic init (uniform +-1/sqrt(fan_in), like PyTorch Linear)."""
    def linear(k, fan_in, fan_out):
        kw, kb = jax.random.split(k)
        bound = 1.0 / jnp.sqrt(fan_in)
        w = jax.random.uniform(kw, (fan_in, fan_out), jnp.float32, -bound, bound)
        b = jax.random.uniform(kb, (1, fan_out), jnp.float32, -bound, bound)
        return w, b

    keys = jax.random.split(key, 6)
    wq, bq = linear(keys[0], input_size, input_size)
    wv, bv = linear(keys[1], input_size, input_size)
    w1, b1 = linear(keys[2], input_size, hidden_size)
    w2, b2 = linear(keys[3], hidden_size, hidden_size)
    w3, b3 = linear(keys[4], hidden_size, hidden_size)
    w4, b4 = linear(keys[5], hidden_size, output_size)
    return dict(wq=wq, bq=bq, wv=wv, bv=bv,
                w1=w1, b1=b1, w2=w2, b2=b2, w3=w3, b3=b3, w4=w4, b4=b4)


def model3_reference(x, p):
    """Pure-JAX reference matching the PyTorch forward exactly."""
    tm = jnp.mean(x, axis=1)
    qtm = tm @ p["wq"] + p["bq"]
    att = jnp.einsum('bsd,bd->bs', x, qtm)
    att = jax.nn.softmax(att, axis=1)
    v = jnp.einsum('bsd,de->bse', x, p["wv"]) + p["bv"][None, :, :]
    pooled = jnp.sum(v * att[:, :, None], axis=1)
    h = jax.nn.relu(pooled @ p["w1"] + p["b1"])
    h = jax.nn.relu(h @ p["w2"] + p["b2"])
    h = jax.nn.relu(h @ p["w3"] + p["b3"])
    return jax.nn.sigmoid(h @ p["w4"] + p["b4"])


if __name__ == "__main__":
    # Small shapes consistent with the module: (batch, seq, input_size)
    B, S, D = 2, 8, 32          # input_size = 32
    H, O = 32, 1                # hidden_size = 32, output_size = 1

    key = jax.random.PRNGKey(0)
    kx, kp = jax.random.split(key)
    x = jax.random.normal(kx, (B, S, D), dtype=jnp.float32)
    params = init_params(kp, D, H, O)
    w_all, b_all = pack_params(params, D)

    out = model3_forward(x, w_all, b_all, output_size=O)
    out = jax.block_until_ready(out)

    ref = model3_reference(x, params)
    assert out.shape == (B, O)
    assert jnp.allclose(out, ref, atol=1e-5, rtol=1e-5), (out, ref)

    print("KERNEL_OK")
</pallas_src>

<mosaic_0001>
module attributes {stable_mosaic.version = 11 : i64} {
  func.func @_model3_kernel(%arg0: memref<2x8x32xf32, #tpu.memory_space<vmem>>, %arg1: memref<6x32x128xf32, #tpu.memory_space<vmem>>, %arg2: memref<6x128xf32, #tpu.memory_space<vmem>>, %arg3: memref<2x128xf32, #tpu.memory_space<vmem>>) attributes {dimension_semantics = [], scalar_prefetch = 0 : i64, scratch_operands = 0 : i64, tpu.core_type = #tpu.core_type<tc>} {
    %c0 = arith.constant 0 : index
    %c0_0 = arith.constant 0 : index
    %c0_1 = arith.constant 0 : index
    %0 = vector.load %arg0[%c0, %c0_0, %c0_1] : memref<2x8x32xf32, #tpu.memory_space<vmem>>, vector<2x8x32xf32>
    %c0_2 = arith.constant 0 : index
    %c0_3 = arith.constant 0 : index
    %c0_4 = arith.constant 0 : index
    %1 = vector.load %arg1[%c0_2, %c0_3, %c0_4] : memref<6x32x128xf32, #tpu.memory_space<vmem>>, vector<6x32x128xf32>
    %c0_5 = arith.constant 0 : index
    %c0_6 = arith.constant 0 : index
    %2 = vector.load %arg2[%c0_5, %c0_6] : memref<6x128xf32, #tpu.memory_space<vmem>>, vector<6x128xf32>
    %3 = vector.extract_strided_slice %1 {offsets = [0, 0, 0], sizes = [1, 32, 32], strides = [1, 1, 1]} : vector<6x32x128xf32> to vector<1x32x32xf32>
    %4 = vector.shape_cast %3 : vector<1x32x32xf32> to vector<32x32xf32>
    %5 = vector.extract_strided_slice %1 {offsets = [1, 0, 0], sizes = [1, 32, 32], strides = [1, 1, 1]} : vector<6x32x128xf32> to vector<1x32x32xf32>
    %6 = vector.shape_cast %5 : vector<1x32x32xf32> to vector<32x32xf32>
    %7 = vector.extract_strided_slice %1 {offsets = [2, 0, 0], sizes = [1, 32, 32], strides = [1, 1, 1]} : vector<6x32x128xf32> to vector<1x32x32xf32>
    %8 = vector.shape_cast %7 : vector<1x32x32xf32> to vector<32x32xf32>
    %9 = vector.extract_strided_slice %1 {offsets = [3, 0, 0], sizes = [1, 32, 32], strides = [1, 1, 1]} : vector<6x32x128xf32> to vector<1x32x32xf32>
    %10 = vector.shape_cast %9 : vector<1x32x32xf32> to vector<32x32xf32>
    %11 = vector.extract_strided_slice %1 {offsets = [4, 0, 0], sizes = [1, 32, 32], strides = [1, 1, 1]} : vector<6x32x128xf32> to vector<1x32x32xf32>
    %12 = vector.shape_cast %11 : vector<1x32x32xf32> to vector<32x32xf32>
    %13 = vector.extract_strided_slice %1 {offsets = [5, 0, 0], sizes = [1, 32, 128], strides = [1, 1, 1]} : vector<6x32x128xf32> to vector<1x32x128xf32>
    %14 = vector.shape_cast %13 : vector<1x32x128xf32> to vector<32x128xf32>
    %15 = vector.extract_strided_slice %2 {offsets = [0, 0], sizes = [1, 32], strides = [1, 1]} : vector<6x128xf32> to vector<1x32xf32>
    %16 = vector.extract_strided_slice %2 {offsets = [1, 0], sizes = [1, 32], strides = [1, 1]} : vector<6x128xf32> to vector<1x32xf32>
    %17 = vector.extract_strided_slice %2 {offsets = [2, 0], sizes = [1, 32], strides = [1, 1]} : vector<6x128xf32> to vector<1x32xf32>
    %18 = vector.extract_strided_slice %2 {offsets = [3, 0], sizes = [1, 32], strides = [1, 1]} : vector<6x128xf32> to vector<1x32xf32>
    %19 = vector.extract_strided_slice %2 {offsets = [4, 0], sizes = [1, 32], strides = [1, 1]} : vector<6x128xf32> to vector<1x32xf32>
    %20 = vector.extract_strided_slice %2 {offsets = [5, 0], sizes = [1, 128], strides = [1, 1]} : vector<6x128xf32> to vector<1x128xf32>
    %cst = arith.constant dense<0.000000e+00> : vector<2x32xf32>
    %21 = vector.multi_reduction <add>, %0, %cst [1] : vector<2x8x32xf32> to vector<2x32xf32>
    %cst_7 = arith.constant 8.000000e+00 : f32
    %22 = vector.broadcast %cst_7 : f32 to vector<2x32xf32>
    %23 = arith.divf %21, %22 : vector<2x32xf32>
    %cst_8 = arith.constant dense<0.000000e+00> : vector<2x32xf32>
    %24 = tpu.matmul %23, %4, %cst_8 {dimension_numbers = #tpu.dot_dimension_numbers<[1], [0], [0], [1], [0, 0, 1, 1], [], []>} : vector<2x32xf32>, vector<32x32xf32>, vector<2x32xf32> -> vector<2x32xf32>
    %25 = vector.broadcast %15 : vector<1x32xf32> to vector<2x32xf32>
    %26 = arith.addf %24, %25 : vector<2x32xf32>
    %27 = vector.shape_cast %26 : vector<2x32xf32> to vector<2x1x32xf32>
    %28 = vector.broadcast %27 : vector<2x1x32xf32> to vector<2x8x32xf32>
    %29 = arith.mulf %0, %28 : vector<2x8x32xf32>
    %cst_9 = arith.constant dense<0.000000e+00> : vector<2x8xf32>
    %30 = vector.multi_reduction <add>, %29, %cst_9 [2] : vector<2x8x32xf32> to vector<2x8xf32>
    %cst_10 = arith.constant dense<0xFF800000> : vector<2xf32>
    %31 = vector.multi_reduction <maximumf>, %30, %cst_10 [1] : vector<2x8xf32> to vector<2xf32>
    %32 = vector.shape_cast %31 : vector<2xf32> to vector<2x1xf32>
    %33 = vector.broadcast %32 : vector<2x1xf32> to vector<2x8xf32>
    %34 = arith.subf %30, %33 : vector<2x8xf32>
    %35 = math.exp %34 : vector<2x8xf32>
    %cst_11 = arith.constant dense<0.000000e+00> : vector<2xf32>
    %36 = vector.multi_reduction <add>, %35, %cst_11 [1] : vector<2x8xf32> to vector<2xf32>
    %37 = vector.shape_cast %36 : vector<2xf32> to vector<2x1xf32>
    %38 = vector.broadcast %37 : vector<2x1xf32> to vector<2x8xf32>
    %39 = arith.divf %35, %38 : vector<2x8xf32>
    %40 = vector.shape_cast %39 : vector<2x8xf32> to vector<2x8x1xf32>
    %41 = vector.broadcast %40 : vector<2x8x1xf32> to vector<2x8x32xf32>
    %42 = arith.mulf %0, %41 : vector<2x8x32xf32>
    %cst_12 = arith.constant dense<0.000000e+00> : vector<2x32xf32>
    %43 = vector.multi_reduction <add>, %42, %cst_12 [1] : vector<2x8x32xf32> to vector<2x32xf32>
    %cst_13 = arith.constant dense<0.000000e+00> : vector<2x32xf32>
    %44 = tpu.matmul %43, %6, %cst_13 {dimension_numbers = #tpu.dot_dimension_numbers<[1], [0], [0], [1], [0, 0, 1, 1], [], []>} : vector<2x32xf32>, vector<32x32xf32>, vector<2x32xf32> -> vector<2x32xf32>
    %45 = vector.broadcast %16 : vector<1x32xf32> to vector<2x32xf32>
    %46 = arith.addf %44, %45 : vector<2x32xf32>
    %cst_14 = arith.constant dense<0.000000e+00> : vector<2x32xf32>
    %47 = tpu.matmul %46, %8, %cst_14 {dimension_numbers = #tpu.dot_dimension_numbers<[1], [0], [0], [1], [0, 0, 1, 1], [], []>} : vector<2x32xf32>, vector<32x32xf32>, vector<2x32xf32> -> vector<2x32xf32>
    %48 = vector.broadcast %17 : vector<1x32xf32> to vector<2x32xf32>
    %49 = arith.addf %47, %48 : vector<2x32xf32>
    %cst_15 = arith.constant 0.000000e+00 : f32
    %50 = vector.broadcast %cst_15 : f32 to vector<2x32xf32>
    %51 = arith.maximumf %49, %50 : vector<2x32xf32>
    %cst_16 = arith.constant dense<0.000000e+00> : vector<2x32xf32>
    %52 = tpu.matmul %51, %10, %cst_16 {dimension_numbers = #tpu.dot_dimension_numbers<[1], [0], [0], [1], [0, 0, 1, 1], [], []>} : vector<2x32xf32>, vector<32x32xf32>, vector<2x32xf32> -> vector<2x32xf32>
    %53 = vector.broadcast %18 : vector<1x32xf32> to vector<2x32xf32>
    %54 = arith.addf %52, %53 : vector<2x32xf32>
    %cst_17 = arith.constant 0.000000e+00 : f32
    %55 = vector.broadcast %cst_17 : f32 to vector<2x32xf32>
    %56 = arith.maximumf %54, %55 : vector<2x32xf32>
    %cst_18 = arith.constant dense<0.000000e+00> : vector<2x32xf32>
    %57 = tpu.matmul %56, %12, %cst_18 {dimension_numbers = #tpu.dot_dimension_numbers<[1], [0], [0], [1], [0, 0, 1, 1], [], []>} : vector<2x32xf32>, vector<32x32xf32>, vector<2x32xf32> -> vector<2x32xf32>
    %58 = vector.broadcast %19 : vector<1x32xf32> to vector<2x32xf32>
    %59 = arith.addf %57, %58 : vector<2x32xf32>
    %cst_19 = arith.constant 0.000000e+00 : f32
    %60 = vector.broadcast %cst_19 : f32 to vector<2x32xf32>
    %61 = arith.maximumf %59, %60 : vector<2x32xf32>
    %cst_20 = arith.constant dense<0.000000e+00> : vector<2x128xf32>
    %62 = tpu.matmul %61, %14, %cst_20 {dimension_numbers = #tpu.dot_dimension_numbers<[1], [0], [0], [1], [0, 0, 1, 1], [], []>} : vector<2x32xf32>, vector<32x128xf32>, vector<2x128xf32> -> vector<2x128xf32>
    %63 = vector.broadcast %20 : vector<1x128xf32> to vector<2x128xf32>
    %64 = arith.addf %62, %63 : vector<2x128xf32>
    %65 = arith.negf %64 : vector<2x128xf32>
    %66 = math.exp %65 : vector<2x128xf32>
    %cst_21 = arith.constant 1.000000e+00 : f32
    %67 = vector.broadcast %cst_21 : f32 to vector<2x128xf32>
    %68 = arith.addf %67, %66 : vector<2x128xf32>
    %69 = arith.divf %67, %68 : vector<2x128xf32>
    %c0_22 = arith.constant 0 : index
    %c0_23 = arith.constant 0 : index
    %70 = vector.load %arg3[%c0_22, %c0_23] : memref<2x128xf32, #tpu.memory_space<vmem>>, vector<2x128xf32>
    tpu.vector_store %arg3[%c0_22, %c0_23], %69 {strides = array<i32>} : memref<2x128xf32, #tpu.memory_space<vmem>>, vector<2x128xf32>,
    return
  }
}

</mosaic_0001>

<bundles_post_ra>
// kernel: tpu_custom_call.1
= control target key start
LH: loop header
LB: loop body
LE: loop exit
PB: predicated region body
PF: predicated region fallthrough
CT: control target
= control target key end

     0   :  { %8 = vsyncpa [#allocation3], 0  ;;  %s1149_s0 = inlined_call_operand.hbm [shape: f32[2,8,32], index: 0, kind: input, shape index: {}]   ;;  %s1150_s1 = inlined_call_operand.hbm [shape: f32[6,32,128], index: 1, kind: input, shape index: {}]   ;;  %s1151_s2 = inlined_call_operand.hbm [shape: f32[6,128], index: 2, kind: input, shape index: {}]   ;;  %s1152_s3 = inlined_call_operand.hbm [shape: f32[2,128], index: 3, kind: output, shape index: {}]  }
   0x1   :  { %9 = vsyncpa [#allocation6], 0 }
   0x2   :  { %10 = vsyncpa [#allocation4], 0  ;;  %s988_s12 = smov [#allocation5]   ;;  %s989_s14 = smov [#allocation2]  }
   0x3   :  { %s28_s13 = sshll.u32 %s988_s12, 4  ;;  %s16_s15 = sshll.u32 %s989_s14, 4  ;;  %s29_s13 = int_to_ptr.vmem [resolvable:$true] %s28_s13  ;;  %s1019_s15 = int_to_ptr.vmem [resolvable:$true] %s16_s15 }
   0x4   :  { %s894_s18 = scalar_lea.hbm %s1150_s1, 3072 }
   0x5   :  { %p895_p0 = scmp.ne.s32.totalorder %s1150_s1, %s894_s18  ;;  %p898_p1 = scmp.lt.u32.totalorder %s894_s18, %s1150_s1 }
   0x7   :  { %p900_p2 = pnand %p898_p1, %p895_p0 }
   0x9   :  { %903 = shalt.err (!%p900_p2)
}
   0xa   :  { %s904_s23 = scalar_lea.vmem %s29_s13, 3072  ;;  %p909_p4 = scmp.lt.s32.totalorder %s29_s13, %s29_s13 }
   0xb   :  { %p905_p3 = scmp.ne.s32.totalorder %s29_s13, %s904_s23  ;;  %p910_p5 = scmp.lt.s32.totalorder %s904_s23, %s904_s23 }
   0xd   :  { %p911_p6 = por %p910_p5, %p909_p4 }
   0xf   :  { %p912_p7 = pnand %p911_p6, %p905_p3 }
  0x11   :  { %915 = shalt.err (!%p912_p7)
}
  0x12   :  { %s990_s24 = smov 128   ;;  %s991_s25 = smov 8  }
  0x13   :  { %34 = dma.hbm_to_vmem [thread:$0]  %s1150_s1, 3072, %s29_s13, [#allocation6], %s990_s24, %s990_s24, %s991_s25  }
  0x14   :  { %s916_s30 = scalar_lea.hbm %s1149_s0, 256 }
  0x15   :  { %p917_p8 = scmp.ne.s32.totalorder %s1149_s0, %s916_s30  ;;  %p920_p9 = scmp.lt.u32.totalorder %s916_s30, %s1149_s0 }
  0x17   :  { %p922_p10 = pnand %p920_p9, %p917_p8 }
  0x19   :  { %925 = shalt.err (!%p922_p10)
}
  0x1a   :  { %s926_s8 = scalar_lea.vmem %s1019_s15, 256  ;;  %p931_p12 = scmp.lt.s32.totalorder %s1019_s15, %s1019_s15 }
  0x1b   :  { %p927_p11 = scmp.ne.s32.totalorder %s1019_s15, %s926_s8  ;;  %p932_p13 = scmp.lt.s32.totalorder %s926_s8, %s926_s8 }
  0x1d   :  { %p933_p0 = por %p932_p13, %p931_p12 }
  0x1f   :  { %p934_p1 = pnand %p933_p0, %p927_p11 }
  0x21   :  { %937 = shalt.err (!%p934_p1)
}
  0x22   :  { %22 = dma.hbm_to_vmem [thread:$0]  %s1149_s0, 256, %s1019_s15, [#allocation3], %s990_s24, %s990_s24, %s991_s25  }
  0x23   :  { %s992_s10 = smov [#allocation7]   ;;  %s938_s14 = scalar_lea.hbm %s1151_s2, 128 }
  0x24   :  { %s41_s11 = sshll.u32 %s992_s10, 4  ;;  %p939_p2 = scmp.ne.s32.totalorder %s1151_s2, %s938_s14  ;;  %s42_s11 = int_to_ptr.vmem [resolvable:$true] %s41_s11 }
  0x25   :  { %p942_p3 = scmp.lt.u32.totalorder %s938_s14, %s1151_s2 }
  0x27   :  { %p944_p4 = pnand %p942_p3, %p939_p2 }
  0x29   :  { %947 = shalt.err (!%p944_p4)
}
  0x2a   :  { %s948_s20 = scalar_lea.vmem %s42_s11, 128  ;;  %p953_p6 = scmp.lt.s32.totalorder %s42_s11, %s42_s11 }
  0x2b   :  { %p949_p5 = scmp.ne.s32.totalorder %s42_s11, %s948_s20  ;;  %p954_p7 = scmp.lt.s32.totalorder %s948_s20, %s948_s20 }
  0x2d   :  { %p955_p8 = por %p954_p7, %p953_p6 }
  0x2f   :  { %p956_p9 = pnand %p955_p8, %p949_p5 }
  0x31   :  { %959 = shalt.err (!%p956_p9)
}
  0x32   :  { %44 = dma.hbm_to_vmem [thread:$0]  %s1151_s2, 128, %s42_s11, [#allocation6]  }
  0x33   :  { %982 = dma.done.wait [#allocation3], 256  }
  0x34   :  { %983 = vsyncadd [#allocation3], 4294967040 }
  0x35   :  { %984 = dma.done.wait [#allocation6], 3200  }
  0x36   :  { %985 = vsyncadd [#allocation6], 4294964096  ;;  %v993_v0 = vmov 0.0|0.0   ;;  %vm994_vm0 = vmmov 0   ;;  %v995_v1 = vmov 0.0   ;;  %vm81_vm1 = vcmask 261120  }
  0x37   :  { %833 = vmatprep.subr.bf16.mxu0 %v993_v0  ;;  %775 = vmatprep.mubr.msk.f32.mxu0 %vm994_vm0, %v995_v1  ;;  %v56_v2 = vld [vmem:[#allocation5] sm:$0xff]  ;;  %v57_v3 = vld [vmem:[#allocation5 + $0x8] sm:$0xff]  ;;  %v58_v4 = vld [vmem:[#allocation5 + $0x10] sm:$0xff]  ;;  %vm105_vm2 = vcmask 1041409   ;;  %v99_v27 = vlaneseq  ;;  %v996_v29 = vmov 1966171168  }
  0x38   :  { %839 = vmatprep.subr.bf16.mxu1 %v993_v0  ;;  %786 = vmatprep.mubr.msk.f32.mxu1 %vm994_vm0, %v995_v1  ;;  %v834_v5 = vpack.c.bf16 %v57_v3, %v56_v2  ;;  %v59_v6 = vld [vmem:[#allocation5 + $0x18] sm:$0xff]  ;;  %v1068_v7 = vld [vmem:[#allocation2] sm:$0xff]  ;;  %v181_v30 = vunpack.c.l.s4 %v996_v29  ;;  %v1085_v32 = vld [vmem:[#allocation7] sm:$0x3f]  ;;  %vm234_vm3 = vcmask 58368   ;;  %v997_v57 = vmov 0  }
  0x39   :  { %v1070_v8 = vld [vmem:[#allocation2 + $0x8] sm:$0xff]  ;;  %v82_v9 = vsel %vm81_vm1, %v1068_v7, 0.0  ;;  %v837_v11 = vpack.c.bf16 %v59_v6, %v58_v4  ;;  %v1082_v28 = vshrl.u32 %v99_v27, 7  ;;  %v223_v49 = vand.u32 127, %v99_v27  ;;  %881 = vset.pattern.permute.xlu0 %v997_v57  ;;  %880 = vset.pattern.permute.xlu1 %v997_v57  ;;  %v64_v27 = vld [vmem:[#allocation5 + $0x40] sm:$0xff]  ;;  %v65_v29 = vld [vmem:[#allocation5 + $0x48] sm:$0xff] }
  0x3a   :  { %v89_v10 = vsel %vm81_vm1, %v1070_v8, 0.0  ;;  %835 = vmatpush3.bf16.msra.mxu0 %v834_v5  ;;  %v83_v12 = vrot.slane %v82_v9, 4  ;;  %v182_v33 = vunpack.c.0.s8 %v181_v30  ;;  %v846_v30 = vpack.c.bf16 %v65_v29, %v64_v27  ;;  %s998_s2 = smov [#allocation8]  }
  0x3b   :  { %v90_v13 = vrot.slane %v89_v10, 4  ;;  %836 = vmatprep.subr.bf16.mxu0 %v993_v0  ;;  %v101_v31 = vsub.s32 0, %v1082_v28  ;;  %v226_v51 = vsub.s32 %v223_v49, %v1082_v28  ;;  %v1097_v58 = vsub.s32 1, %v1082_v28  ;;  %s720_s21 = sshll.u32 %s998_s2, 4  ;;  %s721_s21 = int_to_ptr.vmem [resolvable:$true] %s720_s21 }
  0x3c   :  { %v84_v14 = vadd.f32 %v83_v12, %v82_v9  ;;  %v185_v35 = vsub.s32 %v182_v33, %v1082_v28  ;;  %s960_s22 = scalar_lea.vmem %s721_s21, 32  ;;  %p965_p11 = scmp.lt.s32.totalorder %s721_s21, %s721_s21 }
  0x3d   :  { %v91_v15 = vadd.f32 %v90_v13, %v89_v10  ;;  %v102_v34 = vrot.slane %v1085_v32, %v101_v31  ;;  %p961_p10 = scmp.ne.s32.totalorder %s721_s21, %s960_s22  ;;  %p966_p12 = scmp.lt.s32.totalorder %s960_s22, %s960_s22 }
  0x3e   :  { %838 = vmatpush3.bf16.msra.mxu0 %v837_v11  ;;  %v85_v16 = vrot.slane %v84_v14, 2 }
  0x3f   :  { %v92_v17 = vrot.slane %v91_v15, 2  ;;  %845 = vmatprep.subr.bf16.mxu0 %v993_v0  ;;  %p967_p13 = por %p966_p12, %p965_p11 }
  0x40   :  { %v86_v18 = vadd.f32 %v85_v16, %v84_v14 }
  0x41   :  { %v93_v19 = vadd.f32 %v92_v17, %v91_v15  ;;  %p968_p0 = pnand %p967_p13, %p961_p10 }
  0x42   :  { %v87_v20 = vrot.slane %v86_v18, 1 }
  0x43   :  { %v94_v21 = vrot.slane %v93_v19, 1 }
  0x44   :  { %v88_v22 = vadd.f32 %v87_v20, %v86_v18 }
  0x45   :  { %v95_v23 = vadd.f32 %v94_v21, %v93_v19  ;;  %v60_v21 = vld [vmem:[#allocation5 + $0x20] sm:$0xff] }
  0x46   :  { %v97_v24 = vmul.f32 0.125, %v88_v22  ;;  %v61_v22 = vld [vmem:[#allocation5 + $0x28] sm:$0xff] }
  0x47   :  { %v98_v25 = vmul.f32 0.125, %v95_v23  ;;  %v840_v23 = vpack.c.bf16 %v61_v22, %v60_v21 }
  0x49   :  { %v106_v26 = vsel %vm105_vm2, %v98_v25, %v97_v24  ;;  %841 = vmatpush3.bf16.msra.mxu1 %v840_v23  ;;  %v62_v24 = vld [vmem:[#allocation5 + $0x30] sm:$0xff]  ;;  %v63_v25 = vld [vmem:[#allocation5 + $0x38] sm:$0xff] }
  0x4a   :  { %776 = vmatmul.mubr.msk.f32.vlgmr.msra.gmra.mrb[0].mxu0 %vm81_vm1, %v106_v26  ;;  %842 = vmatprep.subr.bf16.mxu1 %v993_v0  ;;  %v843_v26 = vpack.c.bf16 %v63_v25, %v62_v24  ;;  %v79_v23 = vld [vmem:[#allocation5 + $0xb8] sm:$0xff]  ;;  %v554_v25 = vsub.s32 4, %v1082_v28 }
  0x4b   :  { %797 = vmatprep.mubr.msk.f32.mxu0 %vm994_vm0, %v995_v1  ;;  %847 = vmatpush3.bf16.msra.mxu0 %v846_v30 }
  0x4c   :  { %848 = vmatprep.subr.bf16.mxu0 %v993_v0 }
  0x4d   :  { %844 = vmatpush3.bf16.msra.mxu1 %v843_v26  ;;  %v555_v26 = vrot.slane %v1085_v32, %v554_v25 }
  0x4e   :  { %851 = vmatprep.subr.bf16.mxu1 %v993_v0 }
 0x11d   :  { %v175_v36 = vpop.f32.mrb[0].mxu0 }
 0x11e   :  { %v176_v37 = vadd.f32 %v175_v36, %v102_v34  ;;  %v777_v38 = vpop.f32.mrb[1].mxu0 }
 0x120   :  { %v186_v39 = vrot.slane %v176_v37, %v185_v35 }
 0x122   :  { %v187_v40 = vcombine.high %v186_v39, %v186_v39  ;;  %v194_v41 = vrot.slane %v186_v39, %v185_v35 }
 0x124   :  { %v205_v42 = vrot.slane %v194_v41, %v101_v31  ;;  %v201_v43 = vrot.slane %v187_v40, %v185_v35 }
 0x126   :  { %v212_v44 = vmul.f32 %v205_v42, %v1068_v7  ;;  %v209_v45 = vrot.slane %v201_v43, %v101_v31 }
 0x128   :  { %v214_v46 = vsel %vm81_vm1, %v212_v44, 0.0  ;;  %v213_v47 = vmul.f32 %v209_v45, %v1070_v8 }
 0x129   :  { %215 = vadd.xlane.f32.xlu0 %v214_v46 }
 0x12a   :  { %v217_v48 = vsel %vm81_vm1, %v213_v47, 0.0 }
 0x12d   :  { %218 = vadd.xlane.f32.xlu0 %v217_v48 }
 0x1b6   :  { %v216_v50 = vpop.xlane.xlu0 %215 }
 0x1b7   :  { %v227_v53 = vrot.slane %v216_v50, %v226_v51 }
 0x1ba   :  { %v219_v52 = vpop.xlane.xlu0 %218 }
 0x1bb   :  { %v231_v54 = vrot.slane %v219_v52, %v226_v51 }
 0x1bd   :  { %v232_v55 = vsel %vm105_vm2, %v231_v54, %v227_v53  ;;  %v69_v53 = vld [vmem:[#allocation5 + $0x68] sm:$0xff] }
 0x1be   :  { %v235_v56 = vsel %vm234_vm3, %v232_v55, -inf  ;;  %v320_v55 = vrot.slane %v1085_v32, %v1097_v58 }
 0x1bf   :  { %236 = vmax.xlane.f32.xlu1 %v235_v56 }
 0x24c   :  { %v237_v59 = vpop.xlane.xlu1 %236 }
 0x24d   :  { %v242_v60 = vrot.slane %v237_v59, %v101_v31  ;;  %v246_v61 = vrot.slane %v237_v59, %v1097_v58 }
 0x24f   :  { %v249_v62 = vsub.f32 %v216_v50, %v242_v60  ;;  %v250_v63 = vsub.f32 %v219_v52, %v246_v61  ;;  %v67_v50 = vld [vmem:[#allocation5 + $0x58] sm:$0xff]  ;;  %v68_v52 = vld [vmem:[#allocation5 + $0x60] sm:$0xff]  ;;  %v70_v60 = vld [vmem:[#allocation5 + $0x70] sm:$0xff] }
 0x250   :  { %v852_v54 = vpack.c.bf16 %v69_v53, %v68_v52  ;;  %v71_v61 = vld [vmem:[#allocation5 + $0x78] sm:$0xff] }
 0x251   :  { %v251_v2 = vmul.f32 1.442695, %v249_v62  ;;  %v253_v3 = vmul.f32 1.442695, %v250_v63  ;;  %v855_v62 = vpack.c.bf16 %v71_v61, %v70_v60  ;;  %v72_v63 = vld [vmem:[#allocation5 + $0x80] sm:$0xff] }
 0x253   :  { %882 = vpow2.f32 %v251_v2  ;;  %v73_v2 = vld [vmem:[#allocation5 + $0x88] sm:$0xff] }
 0x254   :  { %884 = vpow2.f32 %v253_v3  ;;  %v858_v3 = vpack.c.bf16 %v73_v2, %v72_v63 }
 0x25d   :  { %v883_v4 = vpop.eup %882 }
 0x25e   :  { %v885_v5 = vpop.eup %884  ;;  %258 = vperm.xlu1 %880, %v883_v4  }
 0x25f   :  { %261 = vperm.xlu0 %881, %v885_v5  }
 0x2dd   :  { %v259_v6 = vpop.permute.xlu1 %258 }
 0x2de   :  { %v262_v9 = vpop.permute.xlu0 %261  ;;  %v266_v10 = vrot.slane %v259_v6, %v226_v51 }
 0x2df   :  { %v270_v11 = vrot.slane %v262_v9, %v226_v51 }
 0x2e1   :  { %v271_v12 = vsel %vm105_vm2, %v270_v11, %v266_v10  ;;  %v74_v11 = vld [vmem:[#allocation5 + $0x90] sm:$0xff] }
 0x2e2   :  { %v273_v13 = vsel %vm234_vm3, %v271_v12, 0.0  ;;  %v75_v12 = vld [vmem:[#allocation5 + $0x98] sm:$0xff] }
 0x2e3   :  { %274 = vadd.xlane.f32.xlu1 %v273_v13  ;;  %v861_v13 = vpack.c.bf16 %v75_v12, %v74_v11 }
 0x370   :  { %v275_v14 = vpop.xlane.xlu1 %274 }
 0x371   :  { %v280_v15 = vrot.slane %v275_v14, %v101_v31  ;;  %v284_v16 = vrot.slane %v275_v14, %v1097_v58  ;;  %v398_v58 = vsub.s32 2, %v1082_v28  ;;  %v76_v14 = vld [vmem:[#allocation5 + $0xa0] sm:$0xff] }
 0x373   :  { %886 = vrcp.f32 %v280_v15  ;;  %v77_v15 = vld [vmem:[#allocation5 + $0xa8] sm:$0xff] }
 0x374   :  { %888 = vrcp.f32 %v284_v16  ;;  %v864_v16 = vpack.c.bf16 %v77_v15, %v76_v14 }
 0x37d   :  { %v887_v17 = vpop.eup %886 }
 0x37e   :  { %v288_v18 = vmul.f32 %v887_v17, %v883_v4  ;;  %v889_v19 = vpop.eup %888  ;;  %v399_v4 = vrot.slane %v1085_v32, %v398_v58  ;;  %v476_v17 = vsub.s32 3, %v1082_v28 }
 0x37f   :  { %v290_v20 = vmul.f32 %v889_v19, %v885_v5 }
 0x380   :  { %293 = vperm.xlu0 %881, %v288_v18   ;;  %v477_v18 = vrot.slane %v1085_v32, %v476_v17 }
 0x384   :  { %298 = vperm.xlu0 %881, %v290_v20  }
 0x3ff   :  { %v294_v31 = vpop.permute.xlu0 %293 }
 0x400   :  { %v301_v33 = vmul.f32 %v294_v31, %v1068_v7  ;;  %v632_v31 = vsub.s32 5, %v1082_v28 }
 0x402   :  { %v303_v34 = vsel %vm81_vm1, %v301_v33, 0.0  ;;  %v633_v33 = vrot.slane %v1085_v32, %v632_v31 }
 0x403   :  { %v304_v35 = vrot.slane %v303_v34, 4  ;;  %v299_v36 = vpop.permute.xlu0 %298 }
 0x404   :  { %v302_v37 = vmul.f32 %v299_v36, %v1070_v8  ;;  %v66_v8 = vld [vmem:[#allocation5 + $0x50] sm:$0xff] }
 0x405   :  { %v305_v38 = vadd.f32 %v304_v35, %v303_v34  ;;  %v849_v51 = vpack.c.bf16 %v67_v50, %v66_v8 }
 0x406   :  { %v310_v39 = vsel %vm81_vm1, %v302_v37, 0.0 }
 0x407   :  { %v306_v40 = vrot.slane %v305_v38, 2  ;;  %v311_v41 = vrot.slane %v310_v39, 4  ;;  %850 = vmatpush3.bf16.msra.mxu0 %v849_v51 }
 0x408   :  { %857 = vmatprep.subr.bf16.mxu0 %v993_v0 }
 0x409   :  { %v307_v42 = vadd.f32 %v306_v40, %v305_v38  ;;  %v312_v43 = vadd.f32 %v311_v41, %v310_v39 }
 0x40b   :  { %v313_v44 = vrot.slane %v312_v43, 2  ;;  %v308_v45 = vrot.slane %v307_v42, 1 }
 0x40d   :  { %v314_v46 = vadd.f32 %v313_v44, %v312_v43  ;;  %v309_v48 = vadd.f32 %v308_v45, %v307_v42 }
 0x40f   :  { %v315_v47 = vrot.slane %v314_v46, 1 }
 0x411   :  { %v316_v49 = vadd.f32 %v315_v47, %v314_v46 }
 0x413   :  { %v323_v7 = vsel %vm105_vm2, %v316_v49, %v309_v48 }
 0x414   :  { %787 = vmatmul.mubr.msk.f32.vlgmr.msra.gmra.mrb[0].mxu1 %vm81_vm1, %v323_v7 }
 0x415   :  { %808 = vmatprep.mubr.msk.f32.mxu1 %vm994_vm0, %v995_v1  ;;  %853 = vmatpush3.bf16.msra.mxu1 %v852_v54 }
 0x416   :  { %854 = vmatprep.subr.bf16.mxu1 %v993_v0 }
 0x419   :  { %856 = vmatpush3.bf16.msra.mxu1 %v855_v62 }
 0x41a   :  { %863 = vmatprep.subr.bf16.mxu1 %v993_v0 }
 0x4e7   :  { %v392_v56 = vpop.f32.mrb[0].mxu1 }
 0x4e8   :  { %v393_v57 = vadd.f32 %v392_v56, %v320_v55  ;;  %v788_v59 = vpop.f32.mrb[1].mxu1 }
 0x4ea   :  { %798 = vmatmul.mubr.msk.f32.vlgmr.msra.gmra.mrb[2].mxu0 %vm81_vm1, %v393_v57 }
 0x4eb   :  { %819 = vmatprep.mubr.msk.f32.mxu0 %vm994_vm0, %v995_v1  ;;  %859 = vmatpush3.bf16.msra.mxu0 %v858_v3 }
 0x4ec   :  { %860 = vmatprep.subr.bf16.mxu0 %v993_v0 }
 0x4ef   :  { %862 = vmatpush3.bf16.msra.mxu0 %v861_v13 }
 0x5bd   :  { %v469_v5 = vpop.f32.mrb[2].mxu0 }
 0x5be   :  { %v470_v6 = vadd.f32 %v469_v5, %v399_v4  ;;  %v799_v9 = vpop.f32.mrb[3].mxu0 }
 0x5c0   :  { %v473_v10 = vmax.f32 %v470_v6, 0.0 }
 0x5c2   :  { %809 = vmatmul.mubr.msk.f32.vlgmr.msra.gmra.mrb[2].mxu1 %vm81_vm1, %v473_v10 }
 0x5c3   :  { %830 = vmatprep.mubr.msk.f32.mxu1 %vm994_vm0, %v995_v1  ;;  %865 = vmatpush3.bf16.msra.mxu1 %v864_v16  ;;  %v78_v1 = vld [vmem:[#allocation5 + $0xb0] sm:$0xff] }
 0x5c4   :  { %866 = vmatprep.subr.bf16.mxu1 %v993_v0  ;;  %v867_v24 = vpack.c.bf16 %v79_v23, %v78_v1 }
 0x5c7   :  { %868 = vmatpush3.bf16.msra.mxu1 %v867_v24 }
 0x695   :  { %v547_v19 = vpop.f32.mrb[2].mxu1 }
 0x696   :  { %v548_v20 = vadd.f32 %v547_v19, %v477_v18  ;;  %v810_v21 = vpop.f32.mrb[3].mxu1 }
 0x698   :  { %v551_v22 = vmax.f32 %v548_v20, 0.0 }
 0x69a   :  { %820 = vmatmul.mubr.msk.f32.vlgmr.msra.gmra.mrb[4].mxu0 %vm81_vm1, %v551_v22 }
 0x76d   :  { %v625_v27 = vpop.f32.mrb[4].mxu0 }
 0x76e   :  { %v626_v0 = vadd.f32 %v625_v27, %v555_v26  ;;  %v821_v29 = vpop.f32.mrb[5].mxu0 }
 0x770   :  { %v629_v30 = vmax.f32 %v626_v0, 0.0 }
 0x772   :  { %831 = vmatmul.mubr.msk.f32.vlgmr.msra.gmra.mrb[4].mxu1 %vm81_vm1, %v629_v30 }
 0x845   :  { %v703_v34 = vpop.f32.mrb[4].mxu1 }
 0x846   :  { %v704_v35 = vadd.f32 %v703_v34, %v633_v33  ;;  %v832_v36 = vpop.f32.mrb[5].mxu1 }
 0x848   :  { %v736_v37 = vmul.f32 -1.442695, %v704_v35 }
 0x84a   :  { %890 = vpow2.f32 %v736_v37 }
 0x854   :  { %v891_v38 = vpop.eup %890 }
 0x855   :  { %v710_v39 = vadd.f32 1.0, %v891_v38 }
 0x857   :  { %892 = vrcp.f32 %v710_v39 }
 0x861   :  { %v893_v40 = vpop.eup %892 }
 0x862   :  { %713 = vst [vmem:[#allocation8] sm:$0x3] %v893_v40 }
 0x863   :  { %971 = shalt.err (!%p968_p0)
}
 0x864   :  { %s972_s25 = scalar_lea.hbm %s1152_s3, 32 }
 0x865   :  { %p973_p1 = scmp.ne.s32.totalorder %s1152_s3, %s972_s25  ;;  %p976_p2 = scmp.lt.u32.totalorder %s972_s25, %s1152_s3 }
 0x867   :  { %p978_p3 = pnand %p976_p2, %p973_p1 }
 0x869   :  { %981 = shalt.err (!%p978_p3)
}
 0x86a   :  { %723 = dma.vmem_to_hbm [thread:$0]  %s721_s21, 32, %s1152_s3, [#allocation4]  }
 0x86b   :  { %986 = dma.done.wait [#allocation4], 32  }
 0x86c   :  { %987 = vsyncadd [#allocation4], 4294967264 }
 0x86d   :  { %727 = vsyncpa [#allocation3], 1 }
 0x86e   :  { %728 = vsyncpa [#allocation6], 1 }
 0x86f   :  { %729 = vsyncpa [#allocation4], 1 }

</bundles_post_ra>
